<compile_context>
chip_gen: v7x
topology: tpu7x:2x2x1
jax: 0.10.0
libtpu: 0.0.40
codegen_flags: <defaults>
</compile_context>

<pallas_src>
import functools

import jax
import jax.numpy as jnp
from jax.experimental import pallas as pl
from jax.experimental.pallas import tpu as pltpu


def _round_up(x, m):
    return (x + m - 1) // m * m


# ----------------------------------------------------------------------------
# Pallas kernel: forward of the actor-critic MLP on one batch tile.
# Matmuls hit the MXU; LayerNorm / softmax use VPU + XLU reductions; the
# softmax reciprocal goes to the EUP.
# ----------------------------------------------------------------------------
def _actor_critic_kernel(x_ref, wt_ref, vec_ref, wout_ref, out_ref, *,
                         state_dim, hidden_dim, action_dim):
    eps = 1e-5

    # ---- unpack VMEM-resident parameter bundles (static slices) ------------
    w1 = wt_ref[0:state_dim, :]                                        # (S, H)
    w2 = wt_ref[state_dim:state_dim + hidden_dim, :]                   # (H, H)
    wh1 = wt_ref[state_dim + hidden_dim:state_dim + 2 * hidden_dim, :]  # (H, H)

    vecs = vec_ref[...]                                                # (8, H)
    b1, g1, be1 = vecs[0:1, :], vecs[1:2, :], vecs[2:3, :]
    b2, g2, be2 = vecs[3:4, :], vecs[4:5, :], vecs[5:6, :]
    bh1 = vecs[6:7, :]

    wh2 = wout_ref[0:hidden_dim, :]                                    # (H, A+1)
    bh2 = wout_ref[hidden_dim:hidden_dim + 1, :]                       # (1, A+1)

    def layernorm(h, gamma, beta):
        mu = jnp.mean(h, axis=-1, keepdims=True)
        d = h - mu
        var = jnp.mean(d * d, axis=-1, keepdims=True)
        return d * jax.lax.rsqrt(var + eps) * gamma + beta

    x = x_ref[...]

    # ---- shared trunk -------------------------------------------------------
    h = jnp.dot(x, w1, preferred_element_type=jnp.float32) + b1
    h = jnp.maximum(h, 0.0)
    h = layernorm(h, g1, be1)
    # Dropout(0.1): identity in eval / inference mode.

    h = jnp.dot(h, w2, preferred_element_type=jnp.float32) + b2
    h = jnp.maximum(h, 0.0)
    h = layernorm(h, g2, be2)
    # Dropout(0.1): identity in eval / inference mode.

    # ---- fused actor + critic heads ----------------------------------------
    # layer 1: columns [0:H/2] = actor hidden, [H/2:H] = critic hidden
    hh = jnp.dot(h, wh1, preferred_element_type=jnp.float32) + bh1
    hh = jnp.maximum(hh, 0.0)
    # layer 2: block-diagonal weight -> lanes [0:A] = logits, lane A = value
    fused = jnp.dot(hh, wh2, preferred_element_type=jnp.float32) + bh2

    # Softmax over the logit lanes only; the value lane is masked out of the
    # reductions so it cannot leak into max/sum.
    lane = jax.lax.broadcasted_iota(jnp.int32, fused.shape, 1)
    is_logit = lane < action_dim
    m = jnp.max(jnp.where(is_logit, fused, jnp.float32(-jnp.inf)),
                axis=-1, keepdims=True)
    e = jnp.where(is_logit, jnp.exp(fused - m), 0.0)
    inv_denom = pl.reciprocal(jnp.sum(e, axis=-1, keepdims=True), approx=True)
    probs = e * inv_denom

    # lanes [0:A] -> action probabilities, lane A -> raw critic value
    out_ref[...] = jnp.where(is_logit, probs, fused)


# ----------------------------------------------------------------------------
# Wrapper
# ----------------------------------------------------------------------------
@functools.partial(jax.jit, static_argnames=("tile_b",))
def actor_critic_forward(state, w_trunk, vecs, w_out, *, tile_b=512):
    """Returns (action_probs, state_value) like ActorCriticNetwork.forward."""
    B, state_dim = state.shape
    hidden_dim = w_trunk.shape[1]
    out_dim = w_out.shape[1]
    action_dim = out_dim - 1

    # Batch tile: multiple of 8 (fp32 sublane), shrunk for tiny batches.
    tile_b = max(8, min(tile_b, _round_up(B, 8)))
    b_pad = _round_up(B, tile_b)
    if b_pad != B:
        state = jnp.pad(state, ((0, b_pad - B), (0, 0)))
    grid = (b_pad // tile_b,)

    kernel = functools.partial(
        _actor_critic_kernel,
        state_dim=state_dim, hidden_dim=hidden_dim, action_dim=action_dim)

    fused = pl.pallas_call(
        kernel,
        out_shape=jax.ShapeDtypeStruct((b_pad, out_dim), jnp.float32),
        grid_spec=pltpu.PrefetchScalarGridSpec(
            num_scalar_prefetch=0,
            grid=grid,
            in_specs=[
                # Streaming batch tile.
                pl.BlockSpec((tile_b, state_dim), lambda i: (i, 0)),
                # Parameters: constant index_map -> VMEM-resident, no re-DMA.
                pl.BlockSpec(w_trunk.shape, lambda i: (0, 0)),
                pl.BlockSpec(vecs.shape, lambda i: (0, 0)),
                pl.BlockSpec(w_out.shape, lambda i: (0, 0)),
            ],
            out_specs=pl.BlockSpec((tile_b, out_dim), lambda i: (i, 0)),
        ),
        compiler_params=pltpu.CompilerParams(
            dimension_semantics=("parallel",)),
    )(state, w_trunk, vecs, w_out)

    probs = fused[:B, :action_dim]
    value = fused[:B, action_dim:]
    return probs, value


# ----------------------------------------------------------------------------
# Deterministic parameter construction (orthogonal weights, gain sqrt(2),
# zero biases; LayerNorm gamma=1, beta=0) — mirrors _initialize_weights().
# Returns both the raw per-layer tensors (for the reference) and the packed
# tensors consumed by the kernel.
# ----------------------------------------------------------------------------
def _orthogonal(key, in_dim, out_dim, gain):
    n = max(in_dim, out_dim)
    a = jax.random.normal(key, (n, n), dtype=jnp.float32)
    q, r = jnp.linalg.qr(a)
    q = q * jnp.sign(jnp.diag(r))  # make decomposition unique
    return (gain * q[:in_dim, :out_dim]).astype(jnp.float32)


def make_params(key, state_dim, action_dim, hidden_dim):
    gain = float(jnp.sqrt(2.0))
    half = hidden_dim // 2
    ks = jax.random.split(key, 6)

    w1 = _orthogonal(ks[0], state_dim, hidden_dim, gain)
    w2 = _orthogonal(ks[1], hidden_dim, hidden_dim, gain)
    wa1 = _orthogonal(ks[2], hidden_dim, half, gain)
    wa2 = _orthogonal(ks[3], half, action_dim, gain)
    wc1 = _orthogonal(ks[4], hidden_dim, half, gain)
    wc2 = _orthogonal(ks[5], half, 1, gain)

    zeros_h = jnp.zeros((1, hidden_dim), jnp.float32)
    ones_h = jnp.ones((1, hidden_dim), jnp.float32)
    b1 = b2 = zeros_h
    g1 = g2 = ones_h
    be1 = be2 = zeros_h
    ba1 = jnp.zeros((1, half), jnp.float32)
    ba2 = jnp.zeros((1, action_dim), jnp.float32)
    bc1 = jnp.zeros((1, half), jnp.float32)
    bc2 = jnp.zeros((1, 1), jnp.float32)

    raw = (w1, b1, g1, be1, w2, b2, g2, be2,
           wa1, ba1, wa2, ba2, wc1, bc1, wc2, bc2)

    # ---- packed form consumed by the Pallas kernel --------------------------
    out_dim = action_dim + 1
    wh1 = jnp.concatenate([wa1, wc1], axis=1)                   # (H, H)
    bh1 = jnp.concatenate([ba1, bc1], axis=1)                   # (1, H)
    wh2 = jnp.zeros((hidden_dim, out_dim), jnp.float32)         # block-diag
    wh2 = wh2.at[:half, :action_dim].set(wa2)
    wh2 = wh2.at[half:, action_dim:].set(wc2)
    bh2 = jnp.concatenate([ba2, bc2], axis=1)                   # (1, A+1)

    w_trunk = jnp.concatenate([w1, w2, wh1], axis=0)            # (S+2H, H)
    vecs = jnp.concatenate(
        [b1, g1, be1, b2, g2, be2, bh1,
         jnp.zeros((1, hidden_dim), jnp.float32)], axis=0)      # (8, H)
    w_out = jnp.concatenate([wh2, bh2], axis=0)                 # (H+1, A+1)

    packed = (w_trunk, vecs, w_out)
    return raw, packed


# ----------------------------------------------------------------------------
# Pure-JAX reference for a sanity check.
# ----------------------------------------------------------------------------
def reference_forward(state, raw):
    (w1, b1, g1, be1, w2, b2, g2, be2,
     wa1, ba1, wa2, ba2, wc1, bc1, wc2, bc2) = raw

    def ln(h, g, b):
        mu = jnp.mean(h, axis=-1, keepdims=True)
        var = jnp.mean((h - mu) ** 2, axis=-1, keepdims=True)
        return (h - mu) / jnp.sqrt(var + 1e-5) * g + b

    h = ln(jax.nn.relu(state @ w1 + b1), g1, be1)
    h = ln(jax.nn.relu(h @ w2 + b2), g2, be2)
    probs = jax.nn.softmax(jax.nn.relu(h @ wa1 + ba1) @ wa2 + ba2, axis=-1)
    value = jax.nn.relu(h @ wc1 + bc1) @ wc2 + bc2
    return probs, value


if __name__ == "__main__":
    state_dim, action_dim, hidden_dim = 16, 4, 32

    key = jax.random.PRNGKey(0)
    k_state, k_params, k_state2 = jax.random.split(key, 3)
    raw, packed = make_params(k_params, state_dim, action_dim, hidden_dim)

    # --- small batch (single grid step) --------------------------------------
    batch = 8
    state = jax.random.normal(k_state, (batch, state_dim), dtype=jnp.float32)
    probs, value = actor_critic_forward(state, *packed)
    jax.block_until_ready((probs, value))

    ref_probs, ref_value = reference_forward(state, raw)
    assert probs.shape == (batch, action_dim) and value.shape == (batch, 1)
    # approx=True reciprocal in the softmax -> slightly relaxed tolerances.
    assert jnp.allclose(probs, ref_probs, atol=5e-3, rtol=5e-3)
    assert jnp.allclose(value, ref_value, atol=1e-4, rtol=1e-4)
    assert jnp.allclose(jnp.sum(probs, axis=-1), 1.0, atol=5e-3)

    # --- batch exercising multiple grid steps + tail padding -----------------
    batch2 = 40
    state2 = jax.random.normal(k_state2, (batch2, state_dim), dtype=jnp.float32)
    probs2, value2 = actor_critic_forward(state2, *packed, tile_b=16)
    jax.block_until_ready((probs2, value2))
    ref_probs2, ref_value2 = reference_forward(state2, raw)
    assert probs2.shape == (batch2, action_dim) and value2.shape == (batch2, 1)
    assert jnp.allclose(probs2, ref_probs2, atol=5e-3, rtol=5e-3)
    assert jnp.allclose(value2, ref_value2, atol=1e-4, rtol=1e-4)

    print("KERNEL_OK")
</pallas_src>

<mosaic_0001>
module attributes {stable_mosaic.version = 11 : i64} {
  func.func @_actor_critic_kernel(%arg0: i32, %arg1: memref<8x16xf32, #tpu.memory_space<vmem>>, %arg2: memref<80x32xf32, #tpu.memory_space<vmem>>, %arg3: memref<8x32xf32, #tpu.memory_space<vmem>>, %arg4: memref<33x5xf32, #tpu.memory_space<vmem>>, %arg5: memref<8x5xf32, #tpu.memory_space<vmem>>) attributes {dimension_semantics = [#tpu.dimension_semantics<parallel>], iteration_bounds = array<i64: 1>, scalar_prefetch = 0 : i64, scratch_operands = 0 : i64, tpu.core_type = #tpu.core_type<tc>, window_params = [{transform_indices = @transform_0, window_bounds = array<i64: 8, 16>}, {pipeline_mode = #tpu.pipeline_mode<synchronous>, transform_indices = @transform_1, window_bounds = array<i64: 80, 32>}, {pipeline_mode = #tpu.pipeline_mode<synchronous>, transform_indices = @transform_2, window_bounds = array<i64: 8, 32>}, {pipeline_mode = #tpu.pipeline_mode<synchronous>, transform_indices = @transform_3, window_bounds = array<i64: 33, 5>}, {transform_indices = @transform_4, window_bounds = array<i64: 8, 5>}]} {
    %c0 = arith.constant 0 : index
    %c0_0 = arith.constant 0 : index
    %0 = vector.load %arg2[%c0, %c0_0] : memref<80x32xf32, #tpu.memory_space<vmem>>, vector<16x32xf32>
    %c16 = arith.constant 16 : index
    %c0_1 = arith.constant 0 : index
    %1 = vector.load %arg2[%c16, %c0_1] : memref<80x32xf32, #tpu.memory_space<vmem>>, vector<32x32xf32>
    %c48 = arith.constant 48 : index
    %c0_2 = arith.constant 0 : index
    %2 = vector.load %arg2[%c48, %c0_2] : memref<80x32xf32, #tpu.memory_space<vmem>>, vector<32x32xf32>
    %c0_3 = arith.constant 0 : index
    %c0_4 = arith.constant 0 : index
    %3 = vector.load %arg3[%c0_3, %c0_4] : memref<8x32xf32, #tpu.memory_space<vmem>>, vector<8x32xf32>
    %4 = vector.extract_strided_slice %3 {offsets = [0, 0], sizes = [1, 32], strides = [1, 1]} : vector<8x32xf32> to vector<1x32xf32>
    %5 = vector.extract_strided_slice %3 {offsets = [1, 0], sizes = [1, 32], strides = [1, 1]} : vector<8x32xf32> to vector<1x32xf32>
    %6 = vector.extract_strided_slice %3 {offsets = [2, 0], sizes = [1, 32], strides = [1, 1]} : vector<8x32xf32> to vector<1x32xf32>
    %7 = vector.extract_strided_slice %3 {offsets = [3, 0], sizes = [1, 32], strides = [1, 1]} : vector<8x32xf32> to vector<1x32xf32>
    %8 = vector.extract_strided_slice %3 {offsets = [4, 0], sizes = [1, 32], strides = [1, 1]} : vector<8x32xf32> to vector<1x32xf32>
    %9 = vector.extract_strided_slice %3 {offsets = [5, 0], sizes = [1, 32], strides = [1, 1]} : vector<8x32xf32> to vector<1x32xf32>
    %10 = vector.extract_strided_slice %3 {offsets = [6, 0], sizes = [1, 32], strides = [1, 1]} : vector<8x32xf32> to vector<1x32xf32>
    %c0_5 = arith.constant 0 : index
    %c0_6 = arith.constant 0 : index
    %11 = vector.load %arg4[%c0_5, %c0_6] : memref<33x5xf32, #tpu.memory_space<vmem>>, vector<32x5xf32>
    %c32 = arith.constant 32 : index
    %c0_7 = arith.constant 0 : index
    %12 = vector.load %arg4[%c32, %c0_7] : memref<33x5xf32, #tpu.memory_space<vmem>>, vector<1x5xf32>
    %c0_8 = arith.constant 0 : index
    %c0_9 = arith.constant 0 : index
    %13 = vector.load %arg1[%c0_8, %c0_9] : memref<8x16xf32, #tpu.memory_space<vmem>>, vector<8x16xf32>
    %cst = arith.constant dense<0.000000e+00> : vector<8x32xf32>
    %14 = tpu.matmul %13, %0, %cst {dimension_numbers = #tpu.dot_dimension_numbers<[1], [0], [0], [1], [0, 0, 1, 1], [], []>} : vector<8x16xf32>, vector<16x32xf32>, vector<8x32xf32> -> vector<8x32xf32>
    %15 = vector.broadcast %4 : vector<1x32xf32> to vector<8x32xf32>
    %16 = arith.addf %14, %15 : vector<8x32xf32>
    %cst_10 = arith.constant 0.000000e+00 : f32
    %17 = vector.broadcast %cst_10 : f32 to vector<8x32xf32>
    %18 = arith.maximumf %16, %17 : vector<8x32xf32>
    %cst_11 = arith.constant dense<0.000000e+00> : vector<8xf32>
    %19 = vector.multi_reduction <add>, %18, %cst_11 [1] : vector<8x32xf32> to vector<8xf32>
    %20 = vector.shape_cast %19 : vector<8xf32> to vector<8x1xf32>
    %cst_12 = arith.constant 3.200000e+01 : f32
    %21 = vector.broadcast %cst_12 : f32 to vector<8x1xf32>
    %22 = arith.divf %20, %21 : vector<8x1xf32>
    %23 = vector.broadcast %22 : vector<8x1xf32> to vector<8x32xf32>
    %24 = arith.subf %18, %23 : vector<8x32xf32>
    %25 = arith.mulf %24, %24 : vector<8x32xf32>
    %cst_13 = arith.constant dense<0.000000e+00> : vector<8xf32>
    %26 = vector.multi_reduction <add>, %25, %cst_13 [1] : vector<8x32xf32> to vector<8xf32>
    %27 = vector.shape_cast %26 : vector<8xf32> to vector<8x1xf32>
    %cst_14 = arith.constant 3.200000e+01 : f32
    %28 = vector.broadcast %cst_14 : f32 to vector<8x1xf32>
    %29 = arith.divf %27, %28 : vector<8x1xf32>
    %cst_15 = arith.constant 9.99999974E-6 : f32
    %30 = vector.broadcast %cst_15 : f32 to vector<8x1xf32>
    %31 = arith.addf %29, %30 : vector<8x1xf32>
    %32 = math.rsqrt %31 : vector<8x1xf32>
    %33 = vector.broadcast %32 : vector<8x1xf32> to vector<8x32xf32>
    %34 = arith.mulf %24, %33 : vector<8x32xf32>
    %35 = vector.broadcast %5 : vector<1x32xf32> to vector<8x32xf32>
    %36 = arith.mulf %34, %35 : vector<8x32xf32>
    %37 = vector.broadcast %6 : vector<1x32xf32> to vector<8x32xf32>
    %38 = arith.addf %36, %37 : vector<8x32xf32>
    %cst_16 = arith.constant dense<0.000000e+00> : vector<8x32xf32>
    %39 = tpu.matmul %38, %1, %cst_16 {dimension_numbers = #tpu.dot_dimension_numbers<[1], [0], [0], [1], [0, 0, 1, 1], [], []>} : vector<8x32xf32>, vector<32x32xf32>, vector<8x32xf32> -> vector<8x32xf32>
    %40 = vector.broadcast %7 : vector<1x32xf32> to vector<8x32xf32>
    %41 = arith.addf %39, %40 : vector<8x32xf32>
    %cst_17 = arith.constant 0.000000e+00 : f32
    %42 = vector.broadcast %cst_17 : f32 to vector<8x32xf32>
    %43 = arith.maximumf %41, %42 : vector<8x32xf32>
    %cst_18 = arith.constant dense<0.000000e+00> : vector<8xf32>
    %44 = vector.multi_reduction <add>, %43, %cst_18 [1] : vector<8x32xf32> to vector<8xf32>
    %45 = vector.shape_cast %44 : vector<8xf32> to vector<8x1xf32>
    %cst_19 = arith.constant 3.200000e+01 : f32
    %46 = vector.broadcast %cst_19 : f32 to vector<8x1xf32>
    %47 = arith.divf %45, %46 : vector<8x1xf32>
    %48 = vector.broadcast %47 : vector<8x1xf32> to vector<8x32xf32>
    %49 = arith.subf %43, %48 : vector<8x32xf32>
    %50 = arith.mulf %49, %49 : vector<8x32xf32>
    %cst_20 = arith.constant dense<0.000000e+00> : vector<8xf32>
    %51 = vector.multi_reduction <add>, %50, %cst_20 [1] : vector<8x32xf32> to vector<8xf32>
    %52 = vector.shape_cast %51 : vector<8xf32> to vector<8x1xf32>
    %cst_21 = arith.constant 3.200000e+01 : f32
    %53 = vector.broadcast %cst_21 : f32 to vector<8x1xf32>
    %54 = arith.divf %52, %53 : vector<8x1xf32>
    %cst_22 = arith.constant 9.99999974E-6 : f32
    %55 = vector.broadcast %cst_22 : f32 to vector<8x1xf32>
    %56 = arith.addf %54, %55 : vector<8x1xf32>
    %57 = math.rsqrt %56 : vector<8x1xf32>
    %58 = vector.broadcast %57 : vector<8x1xf32> to vector<8x32xf32>
    %59 = arith.mulf %49, %58 : vector<8x32xf32>
    %60 = vector.broadcast %8 : vector<1x32xf32> to vector<8x32xf32>
    %61 = arith.mulf %59, %60 : vector<8x32xf32>
    %62 = vector.broadcast %9 : vector<1x32xf32> to vector<8x32xf32>
    %63 = arith.addf %61, %62 : vector<8x32xf32>
    %cst_23 = arith.constant dense<0.000000e+00> : vector<8x32xf32>
    %64 = tpu.matmul %63, %2, %cst_23 {dimension_numbers = #tpu.dot_dimension_numbers<[1], [0], [0], [1], [0, 0, 1, 1], [], []>} : vector<8x32xf32>, vector<32x32xf32>, vector<8x32xf32> -> vector<8x32xf32>
    %65 = vector.broadcast %10 : vector<1x32xf32> to vector<8x32xf32>
    %66 = arith.addf %64, %65 : vector<8x32xf32>
    %cst_24 = arith.constant 0.000000e+00 : f32
    %67 = vector.broadcast %cst_24 : f32 to vector<8x32xf32>
    %68 = arith.maximumf %66, %67 : vector<8x32xf32>
    %cst_25 = arith.constant dense<0.000000e+00> : vector<8x5xf32>
    %69 = tpu.matmul %68, %11, %cst_25 {dimension_numbers = #tpu.dot_dimension_numbers<[1], [0], [0], [1], [0, 0, 1, 1], [], []>} : vector<8x32xf32>, vector<32x5xf32>, vector<8x5xf32> -> vector<8x5xf32>
    %70 = vector.broadcast %12 : vector<1x5xf32> to vector<8x5xf32>
    %71 = arith.addf %69, %70 : vector<8x5xf32>
    %72 = tpu.iota {dimensions = array<i32: 1>} : vector<8x5xi32>
    %c4_i32 = arith.constant 4 : i32
    %73 = vector.broadcast %c4_i32 : i32 to vector<8x5xi32>
    %74 = arith.cmpi slt, %72, %73 : vector<8x5xi32>
    %cst_26 = arith.constant 0xFF800000 : f32
    %75 = vector.broadcast %cst_26 : f32 to vector<8x5xf32>
    %76 = arith.select %74, %71, %75 : vector<8x5xi1>, vector<8x5xf32>
    %cst_27 = arith.constant dense<0xFF800000> : vector<8xf32>
    %77 = vector.multi_reduction <maximumf>, %76, %cst_27 [1] : vector<8x5xf32> to vector<8xf32>
    %78 = vector.shape_cast %77 : vector<8xf32> to vector<8x1xf32>
    %79 = vector.broadcast %78 : vector<8x1xf32> to vector<8x5xf32>
    %80 = arith.subf %71, %79 : vector<8x5xf32>
    %81 = math.exp %80 : vector<8x5xf32>
    %cst_28 = arith.constant 0.000000e+00 : f32
    %82 = vector.broadcast %cst_28 : f32 to vector<8x5xf32>
    %83 = arith.select %74, %81, %82 : vector<8x5xi1>, vector<8x5xf32>
    %cst_29 = arith.constant dense<0.000000e+00> : vector<8xf32>
    %84 = vector.multi_reduction <add>, %83, %cst_29 [1] : vector<8x5xf32> to vector<8xf32>
    %85 = vector.shape_cast %84 : vector<8xf32> to vector<8x1xf32>
    %86 = tpu.reciprocal %85 {approx = true} : vector<8x1xf32> -> vector<8x1xf32>
    %87 = vector.broadcast %86 : vector<8x1xf32> to vector<8x5xf32>
    %88 = arith.mulf %83, %87 : vector<8x5xf32>
    %89 = arith.select %74, %88, %71 : vector<8x5xi1>, vector<8x5xf32>
    %c0_30 = arith.constant 0 : index
    %c0_31 = arith.constant 0 : index
    %90 = vector.load %arg5[%c0_30, %c0_31] : memref<8x5xf32, #tpu.memory_space<vmem>>, vector<8x5xf32>
    tpu.vector_store %arg5[%c0_30, %c0_31], %89 {strides = array<i32>} : memref<8x5xf32, #tpu.memory_space<vmem>>, vector<8x5xf32>,
    return
  }
  func.func @transform_0(%arg0: i32) -> (i32, i32) {
    %c0_i32 = arith.constant 0 : i32
    %c0_i32_0 = arith.constant 0 : i32
    return %arg0, %c0_i32 : i32, i32
  }
  func.func @transform_1(%arg0: i32) -> (i32, i32) {
    %c0_i32 = arith.constant 0 : i32
    %c0_i32_0 = arith.constant 0 : i32
    %c0_i32_1 = arith.constant 0 : i32
    return %c0_i32, %c0_i32_0 : i32, i32
  }
  func.func @transform_2(%arg0: i32) -> (i32, i32) {
    %c0_i32 = arith.constant 0 : i32
    %c0_i32_0 = arith.constant 0 : i32
    %c0_i32_1 = arith.constant 0 : i32
    return %c0_i32, %c0_i32_0 : i32, i32
  }
  func.func @transform_3(%arg0: i32) -> (i32, i32) {
    %c0_i32 = arith.constant 0 : i32
    %c0_i32_0 = arith.constant 0 : i32
    %c0_i32_1 = arith.constant 0 : i32
    return %c0_i32, %c0_i32_0 : i32, i32
  }
  func.func @transform_4(%arg0: i32) -> (i32, i32) {
    %c0_i32 = arith.constant 0 : i32
    %c0_i32_0 = arith.constant 0 : i32
    return %arg0, %c0_i32 : i32, i32
  }
}

</mosaic_0001>

<bundles_post_ra>
// kernel: actor_critic_forward.1
= control target key start
LH: loop header
LB: loop body
LE: loop exit
PB: predicated region body
PF: predicated region fallthrough
CT: control target
= control target key end

     0   :  { %v512_v0 = vmov 0.0|0.0   ;;  %vm513_vm0 = vmmov 0   ;;  %v514_v3 = vmov 0.0   ;;  %vm38_vm1 = vcmask 130048   ;;  %s638_s1 = inlined_call_operand.vmem [shape: f32[80,32], index: 1, kind: input, shape index: {}]   ;;  %s639_s0 = inlined_call_operand.vmem [shape: f32[8,16], index: 0, kind: input, shape index: {}]   ;;  %s640_s2 = inlined_call_operand.vmem [shape: f32[8,32], index: 2, kind: input, shape index: {}]   ;;  %s641_s3 = inlined_call_operand.vmem [shape: f32[33,5], index: 3, kind: input, shape index: {}]   ;;  %s642_s4 = inlined_call_operand.vmem [shape: f32[8,5], index: 4, kind: output, shape index: {}]  }
   0x1   :  { %480 = vmatprep.subr.bf16.mxu0 %v512_v0  ;;  %v17_v1 = vld [vmem:[%s638_s1] sm:$0xff]  ;;  %v18_v2 = vld [vmem:[%s638_s1 + $0x8] sm:$0xff]  ;;  %444 = vmatprep.mubr.msk.f32.mxu0 %vm513_vm0, %v514_v3  ;;  %v34_v6 = vlaneseq  ;;  %vm113_vm2 = vcmask 261120   ;;  %v19_v21 = vld [vmem:[%s638_s1 + $0x10] sm:$0xff]  ;;  %vm398_vm4 = vcmask 39936  }
   0x2   :  { %v481_v4 = vpack.c.bf16 %v18_v2, %v17_v1  ;;  %483 = vmatprep.subr.bf16.mxu1 %v512_v0  ;;  %455 = vmatprep.mubr.msk.f32.mxu1 %vm513_vm0, %v514_v3  ;;  %v33_v5 = vld [vmem:[%s639_s0] sm:$0xff]  ;;  %v20_v22 = vld [vmem:[%s638_s1 + $0x18] sm:$0xff]  ;;  %v22_v25 = vld [vmem:[%s638_s1 + $0x28] sm:$0xff] }
   0x3   :  { %v556_v7 = vshrl.u32 %v34_v6, 7  ;;  %v562_v9 = vld [vmem:[%s640_s2] sm:$0xff]  ;;  %v484_v24 = vpack.c.bf16 %v20_v22, %v19_v21  ;;  %v23_v50 = vld [vmem:[%s638_s1 + $0x30] sm:$0xff]  ;;  %v24_v51 = vld [vmem:[%s638_s1 + $0x38] sm:$0xff] }
   0x4   :  { %482 = vmatpush3.bf16.msra.mxu0 %v481_v4  ;;  %v21_v23 = vld [vmem:[%s638_s1 + $0x20] sm:$0xff]  ;;  %v490_v52 = vpack.c.bf16 %v24_v51, %v23_v50  ;;  %v26_v54 = vld [vmem:[%s638_s1 + $0x48] sm:$0xff] }
   0x5   :  { %489 = vmatprep.subr.bf16.mxu0 %v512_v0  ;;  %v36_v8 = vsub.s32 0, %v556_v7  ;;  %485 = vmatpush3.bf16.msra.mxu1 %v484_v24  ;;  %v487_v26 = vpack.c.bf16 %v22_v25, %v21_v23  ;;  %v130_v30 = vsub.s32 1, %v556_v7  ;;  %v135_v31 = vsub.s32 2, %v556_v7  ;;  %v25_v53 = vld [vmem:[%s638_s1 + $0x40] sm:$0xff]  ;;  %v29_v57 = vld [vmem:[%s641_s3 + $0x8] sm:$0xff] }
   0x6   :  { %486 = vmatprep.subr.bf16.mxu1 %v512_v0  ;;  %v140_v38 = vsub.s32 3, %v556_v7  ;;  %v493_v55 = vpack.c.bf16 %v26_v54, %v25_v53  ;;  %v28_v56 = vld [vmem:[%s641_s3] sm:$0xff]  ;;  %v231_v62 = vsub.s32 4, %v556_v7  ;;  %v236_v63 = vsub.s32 5, %v556_v7 }
   0x7   :  { %445 = vmatmul.mubr.msk.f32.vlgmr.msra.gmra.mrb[0].mxu0 %vm38_vm1, %v33_v5  ;;  %v37_v10 = vrot.slane %v562_v9, %v36_v8  ;;  %v131_v32 = vrot.slane %v562_v9, %v130_v30  ;;  %v136_v35 = vrot.slane %v562_v9, %v135_v31  ;;  %v496_v58 = vpack.c.bf16 %v29_v57, %v28_v56 }
   0x8   :  { %466 = vmatprep.mubr.msk.f32.mxu0 %vm513_vm0, %v514_v3  ;;  %v141_v39 = vrot.slane %v562_v9, %v140_v38  ;;  %491 = vmatpush3.bf16.msra.mxu0 %v490_v52  ;;  %v232_v1 = vrot.slane %v562_v9, %v231_v62  ;;  %v237_v4 = vrot.slane %v562_v9, %v236_v63 }
   0x9   :  { %488 = vmatpush3.bf16.msra.mxu1 %v487_v26  ;;  %492 = vmatprep.subr.bf16.mxu0 %v512_v0 }
   0xa   :  { %495 = vmatprep.subr.bf16.mxu1 %v512_v0 }
   0xc   :  { %494 = vmatpush3.bf16.msra.mxu0 %v493_v55 }
  0xda   :  { %v108_v11 = vpop.f32.mrb[0].mxu0 }
  0xdb   :  { %v109_v12 = vadd.f32 %v108_v11, %v37_v10  ;;  %v446_v13 = vpop.f32.mrb[1].mxu0  ;;  %v31_v10 = vld [vmem:[%s641_s3 + $0x18] sm:$0xff] }
  0xdd   :  { %v112_v14 = vmax.f32 %v109_v12, 0.0  ;;  %v241_v12 = vsub.s32 6, %v556_v7 }
  0xdf   :  { %v114_v15 = vsel %vm113_vm2, %v112_v14, 0.0  ;;  %v242_v13 = vrot.slane %v562_v9, %v241_v12 }
  0xe0   :  { %115 = vadd.xlane.f32.xlu0 %v114_v15 }
 0x16d   :  { %v116_v16 = vpop.xlane.xlu0 %115 }
 0x16e   :  { %v118_v17 = vmul.f32 0.03125, %v116_v16 }
 0x170   :  { %v119_v18 = vsub.f32 %v112_v14, %v118_v17 }
 0x172   :  { %v120_v19 = vmul.f32 %v119_v18, %v119_v18 }
 0x174   :  { %v121_v20 = vsel %vm113_vm2, %v120_v19, 0.0  ;;  %v420_v19 = vld [vmem:[%s641_s3 + $0x20] ss:$0 sm:$0xff] }
 0x175   :  { %122 = vadd.xlane.f32.xlu0 %v121_v20 }
 0x202   :  { %v123_v27 = vpop.xlane.xlu0 %122 }
 0x203   :  { %v124_v28 = vmul.f32 0.03125, %v123_v27 }
 0x205   :  { %v125_v29 = vadd.f32 1e-05, %v124_v28 }
 0x207   :  { %504 = vrsqrt.f32 %v125_v29 }
 0x211   :  { %v505_v33 = vpop.eup %504 }
 0x212   :  { %v127_v34 = vmul.f32 %v505_v33, %v119_v18  ;;  %v395_v18 = vand.u32 127, %v34_v6 }
 0x214   :  { %v132_v36 = vmul.f32 %v131_v32, %v127_v34  ;;  %vm396_vm3 = vcmp.lt.s32.totalorder %v395_v18, 4 }
 0x216   :  { %v137_v37 = vadd.f32 %v136_v35, %v132_v36 }
 0x218   :  { %456 = vmatmul.mubr.msk.f32.vlgmr.msra.gmra.mrb[0].mxu1 %vm113_vm2, %v137_v37 }
 0x219   :  { %477 = vmatprep.mubr.msk.f32.mxu1 %vm513_vm0, %v514_v3  ;;  %497 = vmatpush3.bf16.msra.mxu1 %v496_v58 }
 0x21a   :  { %498 = vmatprep.subr.bf16.mxu1 %v512_v0  ;;  %v30_v0 = vld [vmem:[%s641_s3 + $0x10] sm:$0xff] }
 0x21b   :  { %v499_v11 = vpack.c.bf16 %v31_v10, %v30_v0 }
 0x21d   :  { %500 = vmatpush3.bf16.msra.mxu1 %v499_v11 }
 0x2eb   :  { %v211_v40 = vpop.f32.mrb[0].mxu1 }
 0x2ec   :  { %v212_v41 = vadd.f32 %v211_v40, %v141_v39  ;;  %v457_v42 = vpop.f32.mrb[1].mxu1 }
 0x2ee   :  { %v215_v43 = vmax.f32 %v212_v41, 0.0 }
 0x2f0   :  { %v216_v44 = vsel %vm113_vm2, %v215_v43, 0.0 }
 0x2f1   :  { %217 = vadd.xlane.f32.xlu1 %v216_v44 }
 0x37e   :  { %v218_v45 = vpop.xlane.xlu1 %217 }
 0x37f   :  { %v219_v46 = vmul.f32 0.03125, %v218_v45 }
 0x381   :  { %v220_v47 = vsub.f32 %v215_v43, %v219_v46 }
 0x383   :  { %v221_v48 = vmul.f32 %v220_v47, %v220_v47 }
 0x385   :  { %v222_v49 = vsel %vm113_vm2, %v221_v48, 0.0 }
 0x386   :  { %223 = vadd.xlane.f32.xlu1 %v222_v49 }
 0x413   :  { %v224_v59 = vpop.xlane.xlu1 %223 }
 0x414   :  { %v225_v60 = vmul.f32 0.03125, %v224_v59 }
 0x416   :  { %v226_v61 = vadd.f32 1e-05, %v225_v60 }
 0x418   :  { %506 = vrsqrt.f32 %v226_v61 }
 0x422   :  { %v507_v2 = vpop.eup %506 }
 0x423   :  { %v228_v3 = vmul.f32 %v507_v2, %v220_v47 }
 0x425   :  { %v233_v5 = vmul.f32 %v232_v1, %v228_v3 }
 0x427   :  { %v238_v8 = vadd.f32 %v237_v4, %v233_v5 }
 0x429   :  { %467 = vmatmul.mubr.msk.f32.vlgmr.msra.gmra.mrb[2].mxu0 %vm113_vm2, %v238_v8 }
 0x4fc   :  { %v312_v14 = vpop.f32.mrb[2].mxu0 }
 0x4fd   :  { %v313_v15 = vadd.f32 %v312_v14, %v242_v13  ;;  %v468_v16 = vpop.f32.mrb[3].mxu0 }
 0x4ff   :  { %v316_v17 = vmax.f32 %v313_v15, 0.0 }
 0x501   :  { %478 = vmatmul.mubr.msk.f32.vlgmr.msra.gmra.mrb[2].mxu1 %vm113_vm2, %v316_v17 }
 0x5d4   :  { %v390_v20 = vpop.f32.mrb[2].mxu1 }
 0x5d5   :  { %v391_v21 = vadd.f32 %v420_v19, %v390_v20  ;;  %v479_v22 = vpop.f32.mrb[3].mxu1 }
 0x5d7   :  { %v397_v7 = vsel %vm396_vm3, %v391_v21, -inf }
 0x5d8   :  { %v399_v9 = vsel %vm398_vm4, %v397_v7, -inf }
 0x5d9   :  { %400 = vmax.xlane.f32.xlu0 %v399_v9 }
 0x666   :  { %v401_v23 = vpop.xlane.xlu0 %400 }
 0x667   :  { %v402_v24 = vsub.f32 %v391_v21, %v401_v23 }
 0x669   :  { %v403_v25 = vmul.f32 1.442695, %v402_v24 }
 0x66b   :  { %508 = vpow2.f32 %v403_v25 }
 0x675   :  { %v509_v26 = vpop.eup %508 }
 0x676   :  { %v405_v6 = vsel %vm396_vm3, %v509_v26, 0.0 }
 0x677   :  { %v406_v27 = vsel %vm398_vm4, %v405_v6, 0.0 }
 0x678   :  { %407 = vadd.xlane.f32.xlu1 %v406_v27 }
 0x705   :  { %v408_v28 = vpop.xlane.xlu1 %407 }
 0x706   :  { %510 = vrcp.f32 %v408_v28 }
 0x710   :  { %v511_v29 = vpop.eup %510 }
 0x711   :  { %v410_v30 = vmul.f32 %v511_v29, %v405_v6 }
 0x713   :  { %v411_v31 = vsel %vm396_vm3, %v410_v30, %v391_v21 }
 0x714   :  { %412 = vst.msk [vmem:[%s642_s4] sm:$0xff] %vm398_vm4, %v411_v31 }

</bundles_post_ra>
